<compile_context>
chip_gen: v6e
topology: v6e:2x2x1
jax: 0.10.0
libtpu: 0.0.40
codegen_flags: <defaults>
</compile_context>

<pallas_src>
import math

import jax
import jax.numpy as jnp
from jax.experimental import pallas as pl
from jax.experimental.pallas import tpu as pltpu


def _round_up(x, m):
    return ((x + m - 1) // m) * m


def _make_fused_mlp_kernel(num_layers):
    """kernel(x_ref, w0,b0, w1,b1, ..., o_ref): whole Linear/tanh chain fused."""

    def kernel(*refs):
        x_ref = refs[0]
        o_ref = refs[-1]
        param_refs = refs[1:-1]          # alternating (w, b) refs
        compute_dtype = x_ref.dtype      # bf16 in the demo

        h = x_ref[...]                   # (tm, K0), native dtype -> MXU
        for i in range(num_layers):
            w = param_refs[2 * i][...]               # (K_i, N_i), native dtype
            b = param_refs[2 * i + 1][...]           # (1, N_i), f32
            # MXU consumes bf16 natively; f32 accumulation via preferred type.
            acc = jnp.dot(h, w, preferred_element_type=jnp.float32) + b
            if i != num_layers - 1:
                # bias-add/tanh in f32 (VPU/EUP); back to compute dtype for the
                # next matmul to halve vreg/spill traffic at large row tiles.
                h = jnp.tanh(acc).astype(compute_dtype)
            else:
                o_ref[...] = acc.astype(o_ref.dtype)

    return kernel


def mlp_forward(x, weights, biases, *, row_tile=512, out_lane_multiple=128):
    """x: (..., input_dim). weights[i]: (in_i, out_i). biases[i]: (out_i,)."""
    assert row_tile % 8 == 0
    num_layers = len(weights)
    *lead, input_dim = x.shape
    output_dim = weights[-1].shape[1]
    rows = math.prod(lead) if lead else 1

    x2d = x.reshape(rows, input_dim)

    # ---- lane-dense output: pad the final layer to a multiple of 128 lanes.
    weights = list(weights)
    biases = list(biases)
    padded_out = _round_up(output_dim, out_lane_multiple)
    if padded_out != output_dim:
        pad_n = padded_out - output_dim
        weights[-1] = jnp.pad(weights[-1], ((0, 0), (0, pad_n)))
        biases[-1] = jnp.pad(biases[-1], ((0, pad_n),))

    # ---- row tile: big, multiple of 8; keep the parallel grid >= 2 when
    # possible so v7x's two TensorCores both get work.
    tm = min(row_tile, _round_up(rows, 8))
    if tm >= rows > 8:
        tm = max(8, _round_up(pl.cdiv(rows, 2), 8))
    grid_m = pl.cdiv(rows, tm)
    padded_rows = grid_m * tm
    if padded_rows != rows:
        x2d = jnp.pad(x2d, ((0, padded_rows - rows), (0, 0)))

    # ---- specs: row-tiled activations; params fully resident (constant index).
    in_specs = [pl.BlockSpec((tm, input_dim), lambda i: (i, 0))]
    params = []
    for w, b in zip(weights, biases):
        k, n = w.shape
        in_specs.append(pl.BlockSpec((k, n), lambda i: (0, 0)))
        in_specs.append(pl.BlockSpec((1, n), lambda i: (0, 0)))
        params.append(w)                                   # keep caller's dtype (bf16)
        params.append(b.reshape(1, n).astype(jnp.float32))  # bias stays f32
    out_spec = pl.BlockSpec((tm, padded_out), lambda i: (i, 0))

    # ---- explicit VMEM budget (double-buffered I/O tiles + resident params +
    # f32 intermediate headroom), clamped for v7x's 64-MiB VMEM.
    itemsize = jnp.dtype(x.dtype).itemsize
    param_bytes = sum(int(p.size) * p.dtype.itemsize for p in params)
    io_bytes = tm * input_dim * itemsize + tm * padded_out * itemsize
    max_width = max(w.shape[1] for w in weights)
    inter_bytes = 2 * tm * max_width * 4
    vmem_limit = 2 * (2 * io_bytes + 2 * param_bytes + inter_bytes) + (4 << 20)
    vmem_limit = int(min(max(vmem_limit, 32 << 20), 64 << 20))

    # ---- cost hint for XLA scheduling around the fused kernel.
    flops = 2 * padded_rows * sum(w.shape[0] * w.shape[1] for w in weights)
    transcendentals = padded_rows * sum(w.shape[1] for w in weights[:-1])
    bytes_accessed = (int(x2d.size) * itemsize + param_bytes
                      + padded_rows * padded_out * itemsize)
    cost = pl.CostEstimate(flops=flops, transcendentals=transcendentals,
                           bytes_accessed=bytes_accessed)

    kernel = _make_fused_mlp_kernel(num_layers)

    out2d = pl.pallas_call(
        kernel,
        out_shape=jax.ShapeDtypeStruct((padded_rows, padded_out), x.dtype),
        grid=(grid_m,),
        in_specs=in_specs,
        out_specs=out_spec,
        compiler_params=pltpu.CompilerParams(
            dimension_semantics=("parallel",),
            vmem_limit_bytes=vmem_limit),
        cost_estimate=cost,
    )(x2d, *params)

    out2d = out2d[:rows, :output_dim]
    return out2d.reshape(*lead, output_dim)


def mlp_layer_dims(input_dim, hidden_dim, output_dim, num_layers, step=2.0):
    """Reproduces the MLP.__init__ width schedule: hidden /= step, floored at output_dim."""
    dims = [(input_dim, hidden_dim)]
    tmp_dim = hidden_dim
    for i in range(1, num_layers):
        if i == num_layers - 1:
            dims.append((tmp_dim, output_dim))
        else:
            tmp_hidden_dim = tmp_dim
            tmp_dim = int(tmp_dim / step)
            if tmp_dim < output_dim:
                tmp_dim = tmp_hidden_dim
            dims.append((tmp_hidden_dim, tmp_dim))
    return dims


def init_params(key, input_dim, hidden_dim, output_dim, num_layers, step=2.0):
    """nn.Linear default init (uniform +-1/sqrt(fan_in)), weights stored (in, out)."""
    dims = mlp_layer_dims(input_dim, hidden_dim, output_dim, num_layers, step)
    weights, biases = [], []
    for fan_in, fan_out in dims:
        key, wk, bk = jax.random.split(key, 3)
        bound = 1.0 / math.sqrt(fan_in)
        weights.append(jax.random.uniform(wk, (fan_in, fan_out), jnp.float32,
                                          -bound, bound))
        biases.append(jax.random.uniform(bk, (fan_out,), jnp.float32,
                                         -bound, bound))
    return weights, biases


def reference_forward(x, weights, biases):
    """Pure-JAX reference with the same dtype path as the kernel
    (native-dtype matmul inputs, f32 accumulate/bias/tanh, eval-mode dropout=id)."""
    num_layers = len(weights)
    h = x
    for i, (w, b) in enumerate(zip(weights, biases)):
        acc = jnp.dot(h, w, preferred_element_type=jnp.float32) + b.astype(jnp.float32)
        if i != num_layers - 1:
            h = jnp.tanh(acc).astype(x.dtype)
        else:
            return acc.astype(x.dtype)
    return h


if __name__ == "__main__":
    batch, seq = 2, 8
    input_dim, hidden_dim, output_dim, num_layers = 16, 32, 8, 6

    key = jax.random.PRNGKey(0)
    key, xk = jax.random.split(key)
    x = jax.random.normal(xk, (batch, seq, input_dim), jnp.float32)

    weights, biases = init_params(key, input_dim, hidden_dim, output_dim,
                                  num_layers, step=2.0)

    # Ship bf16 activations + weights; biases and accumulation stay f32.
    x_bf16 = x.astype(jnp.bfloat16)
    w_bf16 = [w.astype(jnp.bfloat16) for w in weights]

    out = mlp_forward(x_bf16, w_bf16, biases, row_tile=512)
    out = jax.block_until_ready(out)

    ref = reference_forward(x_bf16, w_bf16, biases)
    assert out.shape == (batch, seq, output_dim)
    err = jnp.max(jnp.abs(out.astype(jnp.float32) - ref.astype(jnp.float32)))
    assert err < 2e-2, f"mismatch vs reference, max abs err={err}"

    print("KERNEL_OK")
</pallas_src>

<mosaic_0001>
module attributes {stable_mosaic.version = 11 : i64} {
  func.func @kernel(%arg0: i32, %arg1: memref<8x16xbf16, #tpu.memory_space<vmem>>, %arg2: memref<16x32xbf16, #tpu.memory_space<vmem>>, %arg3: memref<1x32xf32, #tpu.memory_space<vmem>>, %arg4: memref<32x16xbf16, #tpu.memory_space<vmem>>, %arg5: memref<1x16xf32, #tpu.memory_space<vmem>>, %arg6: memref<16x8xbf16, #tpu.memory_space<vmem>>, %arg7: memref<1x8xf32, #tpu.memory_space<vmem>>, %arg8: memref<8x8xbf16, #tpu.memory_space<vmem>>, %arg9: memref<1x8xf32, #tpu.memory_space<vmem>>, %arg10: memref<8x8xbf16, #tpu.memory_space<vmem>>, %arg11: memref<1x8xf32, #tpu.memory_space<vmem>>, %arg12: memref<8x128xbf16, #tpu.memory_space<vmem>>, %arg13: memref<1x128xf32, #tpu.memory_space<vmem>>, %arg14: memref<8x128xbf16, #tpu.memory_space<vmem>>) attributes {dimension_semantics = [#tpu.dimension_semantics<parallel>], iteration_bounds = array<i64: 2>, scalar_prefetch = 0 : i64, scratch_operands = 0 : i64, tpu.core_type = #tpu.core_type<tc>, window_params = [{transform_indices = @transform_0, window_bounds = array<i64: 8, 16>}, {pipeline_mode = #tpu.pipeline_mode<synchronous>, transform_indices = @transform_1, window_bounds = array<i64: 16, 32>}, {pipeline_mode = #tpu.pipeline_mode<synchronous>, transform_indices = @transform_2, window_bounds = array<i64: 1, 32>}, {pipeline_mode = #tpu.pipeline_mode<synchronous>, transform_indices = @transform_3, window_bounds = array<i64: 32, 16>}, {pipeline_mode = #tpu.pipeline_mode<synchronous>, transform_indices = @transform_4, window_bounds = array<i64: 1, 16>}, {pipeline_mode = #tpu.pipeline_mode<synchronous>, transform_indices = @transform_5, window_bounds = array<i64: 16, 8>}, {pipeline_mode = #tpu.pipeline_mode<synchronous>, transform_indices = @transform_6, window_bounds = array<i64: 1, 8>}, {pipeline_mode = #tpu.pipeline_mode<synchronous>, transform_indices = @transform_7, window_bounds = array<i64: 8, 8>}, {pipeline_mode = #tpu.pipeline_mode<synchronous>, transform_indices = @transform_8, window_bounds = array<i64: 1, 8>}, {pipeline_mode = #tpu.pipeline_mode<synchronous>, transform_indices = @transform_9, window_bounds = array<i64: 8, 8>}, {pipeline_mode = #tpu.pipeline_mode<synchronous>, transform_indices = @transform_10, window_bounds = array<i64: 1, 8>}, {pipeline_mode = #tpu.pipeline_mode<synchronous>, transform_indices = @transform_11, window_bounds = array<i64: 8, 128>}, {pipeline_mode = #tpu.pipeline_mode<synchronous>, transform_indices = @transform_12, window_bounds = array<i64: 1, 128>}, {transform_indices = @transform_13, window_bounds = array<i64: 8, 128>}]} {
    %c0 = arith.constant 0 : index
    %c0_0 = arith.constant 0 : index
    %0 = vector.load %arg1[%c0, %c0_0] : memref<8x16xbf16, #tpu.memory_space<vmem>>, vector<8x16xbf16>
    %c0_1 = arith.constant 0 : index
    %c0_2 = arith.constant 0 : index
    %1 = vector.load %arg2[%c0_1, %c0_2] : memref<16x32xbf16, #tpu.memory_space<vmem>>, vector<16x32xbf16>
    %c0_3 = arith.constant 0 : index
    %c0_4 = arith.constant 0 : index
    %2 = vector.load %arg3[%c0_3, %c0_4] : memref<1x32xf32, #tpu.memory_space<vmem>>, vector<1x32xf32>
    %cst = arith.constant dense<0.000000e+00> : vector<8x32xf32>
    %3 = tpu.matmul %0, %1, %cst {dimension_numbers = #tpu.dot_dimension_numbers<[1], [0], [0], [1], [0, 0, 1, 1], [], []>} : vector<8x16xbf16>, vector<16x32xbf16>, vector<8x32xf32> -> vector<8x32xf32>
    %4 = vector.broadcast %2 : vector<1x32xf32> to vector<8x32xf32>
    %5 = arith.addf %3, %4 : vector<8x32xf32>
    %6 = math.tanh %5 : vector<8x32xf32>
    %7 = arith.truncf %6 : vector<8x32xf32> to vector<8x32xbf16>
    %c0_5 = arith.constant 0 : index
    %c0_6 = arith.constant 0 : index
    %8 = vector.load %arg4[%c0_5, %c0_6] : memref<32x16xbf16, #tpu.memory_space<vmem>>, vector<32x16xbf16>
    %c0_7 = arith.constant 0 : index
    %c0_8 = arith.constant 0 : index
    %9 = vector.load %arg5[%c0_7, %c0_8] : memref<1x16xf32, #tpu.memory_space<vmem>>, vector<1x16xf32>
    %cst_9 = arith.constant dense<0.000000e+00> : vector<8x16xf32>
    %10 = tpu.matmul %7, %8, %cst_9 {dimension_numbers = #tpu.dot_dimension_numbers<[1], [0], [0], [1], [0, 0, 1, 1], [], []>} : vector<8x32xbf16>, vector<32x16xbf16>, vector<8x16xf32> -> vector<8x16xf32>
    %11 = vector.broadcast %9 : vector<1x16xf32> to vector<8x16xf32>
    %12 = arith.addf %10, %11 : vector<8x16xf32>
    %13 = math.tanh %12 : vector<8x16xf32>
    %14 = arith.truncf %13 : vector<8x16xf32> to vector<8x16xbf16>
    %c0_10 = arith.constant 0 : index
    %c0_11 = arith.constant 0 : index
    %15 = vector.load %arg6[%c0_10, %c0_11] : memref<16x8xbf16, #tpu.memory_space<vmem>>, vector<16x8xbf16>
    %c0_12 = arith.constant 0 : index
    %c0_13 = arith.constant 0 : index
    %16 = vector.load %arg7[%c0_12, %c0_13] : memref<1x8xf32, #tpu.memory_space<vmem>>, vector<1x8xf32>
    %cst_14 = arith.constant dense<0.000000e+00> : vector<8x8xf32>
    %17 = tpu.matmul %14, %15, %cst_14 {dimension_numbers = #tpu.dot_dimension_numbers<[1], [0], [0], [1], [0, 0, 1, 1], [], []>} : vector<8x16xbf16>, vector<16x8xbf16>, vector<8x8xf32> -> vector<8x8xf32>
    %18 = vector.broadcast %16 : vector<1x8xf32> to vector<8x8xf32>
    %19 = arith.addf %17, %18 : vector<8x8xf32>
    %20 = math.tanh %19 : vector<8x8xf32>
    %21 = arith.truncf %20 : vector<8x8xf32> to vector<8x8xbf16>
    %c0_15 = arith.constant 0 : index
    %c0_16 = arith.constant 0 : index
    %22 = vector.load %arg8[%c0_15, %c0_16] : memref<8x8xbf16, #tpu.memory_space<vmem>>, vector<8x8xbf16>
    %c0_17 = arith.constant 0 : index
    %c0_18 = arith.constant 0 : index
    %23 = vector.load %arg9[%c0_17, %c0_18] : memref<1x8xf32, #tpu.memory_space<vmem>>, vector<1x8xf32>
    %cst_19 = arith.constant dense<0.000000e+00> : vector<8x8xf32>
    %24 = tpu.matmul %21, %22, %cst_19 {dimension_numbers = #tpu.dot_dimension_numbers<[1], [0], [0], [1], [0, 0, 1, 1], [], []>} : vector<8x8xbf16>, vector<8x8xbf16>, vector<8x8xf32> -> vector<8x8xf32>
    %25 = vector.broadcast %23 : vector<1x8xf32> to vector<8x8xf32>
    %26 = arith.addf %24, %25 : vector<8x8xf32>
    %27 = math.tanh %26 : vector<8x8xf32>
    %28 = arith.truncf %27 : vector<8x8xf32> to vector<8x8xbf16>
    %c0_20 = arith.constant 0 : index
    %c0_21 = arith.constant 0 : index
    %29 = vector.load %arg10[%c0_20, %c0_21] : memref<8x8xbf16, #tpu.memory_space<vmem>>, vector<8x8xbf16>
    %c0_22 = arith.constant 0 : index
    %c0_23 = arith.constant 0 : index
    %30 = vector.load %arg11[%c0_22, %c0_23] : memref<1x8xf32, #tpu.memory_space<vmem>>, vector<1x8xf32>
    %cst_24 = arith.constant dense<0.000000e+00> : vector<8x8xf32>
    %31 = tpu.matmul %28, %29, %cst_24 {dimension_numbers = #tpu.dot_dimension_numbers<[1], [0], [0], [1], [0, 0, 1, 1], [], []>} : vector<8x8xbf16>, vector<8x8xbf16>, vector<8x8xf32> -> vector<8x8xf32>
    %32 = vector.broadcast %30 : vector<1x8xf32> to vector<8x8xf32>
    %33 = arith.addf %31, %32 : vector<8x8xf32>
    %34 = math.tanh %33 : vector<8x8xf32>
    %35 = arith.truncf %34 : vector<8x8xf32> to vector<8x8xbf16>
    %c0_25 = arith.constant 0 : index
    %c0_26 = arith.constant 0 : index
    %36 = vector.load %arg12[%c0_25, %c0_26] : memref<8x128xbf16, #tpu.memory_space<vmem>>, vector<8x128xbf16>
    %c0_27 = arith.constant 0 : index
    %c0_28 = arith.constant 0 : index
    %37 = vector.load %arg13[%c0_27, %c0_28] : memref<1x128xf32, #tpu.memory_space<vmem>>, vector<1x128xf32>
    %cst_29 = arith.constant dense<0.000000e+00> : vector<8x128xf32>
    %38 = tpu.matmul %35, %36, %cst_29 {dimension_numbers = #tpu.dot_dimension_numbers<[1], [0], [0], [1], [0, 0, 1, 1], [], []>} : vector<8x8xbf16>, vector<8x128xbf16>, vector<8x128xf32> -> vector<8x128xf32>
    %39 = vector.broadcast %37 : vector<1x128xf32> to vector<8x128xf32>
    %40 = arith.addf %38, %39 : vector<8x128xf32>
    %41 = arith.truncf %40 : vector<8x128xf32> to vector<8x128xbf16>
    %c0_30 = arith.constant 0 : index
    %c0_31 = arith.constant 0 : index
    %42 = vector.load %arg14[%c0_30, %c0_31] : memref<8x128xbf16, #tpu.memory_space<vmem>>, vector<8x128xbf16>
    tpu.vector_store %arg14[%c0_30, %c0_31], %41 {strides = array<i32>} : memref<8x128xbf16, #tpu.memory_space<vmem>>, vector<8x128xbf16>,
    return
  }
  func.func @transform_0(%arg0: i32) -> (i32, i32) {
    %c0_i32 = arith.constant 0 : i32
    %c0_i32_0 = arith.constant 0 : i32
    return %arg0, %c0_i32 : i32, i32
  }
  func.func @transform_1(%arg0: i32) -> (i32, i32) {
    %c0_i32 = arith.constant 0 : i32
    %c0_i32_0 = arith.constant 0 : i32
    %c0_i32_1 = arith.constant 0 : i32
    return %c0_i32, %c0_i32_0 : i32, i32
  }
  func.func @transform_2(%arg0: i32) -> (i32, i32) {
    %c0_i32 = arith.constant 0 : i32
    %c0_i32_0 = arith.constant 0 : i32
    %c0_i32_1 = arith.constant 0 : i32
    return %c0_i32, %c0_i32_0 : i32, i32
  }
  func.func @transform_3(%arg0: i32) -> (i32, i32) {
    %c0_i32 = arith.constant 0 : i32
    %c0_i32_0 = arith.constant 0 : i32
    %c0_i32_1 = arith.constant 0 : i32
    return %c0_i32, %c0_i32_0 : i32, i32
  }
  func.func @transform_4(%arg0: i32) -> (i32, i32) {
    %c0_i32 = arith.constant 0 : i32
    %c0_i32_0 = arith.constant 0 : i32
    %c0_i32_1 = arith.constant 0 : i32
    return %c0_i32, %c0_i32_0 : i32, i32
  }
  func.func @transform_5(%arg0: i32) -> (i32, i32) {
    %c0_i32 = arith.constant 0 : i32
    %c0_i32_0 = arith.constant 0 : i32
    %c0_i32_1 = arith.constant 0 : i32
    return %c0_i32, %c0_i32_0 : i32, i32
  }
  func.func @transform_6(%arg0: i32) -> (i32, i32) {
    %c0_i32 = arith.constant 0 : i32
    %c0_i32_0 = arith.constant 0 : i32
    %c0_i32_1 = arith.constant 0 : i32
    return %c0_i32, %c0_i32_0 : i32, i32
  }
  func.func @transform_7(%arg0: i32) -> (i32, i32) {
    %c0_i32 = arith.constant 0 : i32
    %c0_i32_0 = arith.constant 0 : i32
    %c0_i32_1 = arith.constant 0 : i32
    return %c0_i32, %c0_i32_0 : i32, i32
  }
  func.func @transform_8(%arg0: i32) -> (i32, i32) {
    %c0_i32 = arith.constant 0 : i32
    %c0_i32_0 = arith.constant 0 : i32
    %c0_i32_1 = arith.constant 0 : i32
    return %c0_i32, %c0_i32_0 : i32, i32
  }
  func.func @transform_9(%arg0: i32) -> (i32, i32) {
    %c0_i32 = arith.constant 0 : i32
    %c0_i32_0 = arith.constant 0 : i32
    %c0_i32_1 = arith.constant 0 : i32
    return %c0_i32, %c0_i32_0 : i32, i32
  }
  func.func @transform_10(%arg0: i32) -> (i32, i32) {
    %c0_i32 = arith.constant 0 : i32
    %c0_i32_0 = arith.constant 0 : i32
    %c0_i32_1 = arith.constant 0 : i32
    return %c0_i32, %c0_i32_0 : i32, i32
  }
  func.func @transform_11(%arg0: i32) -> (i32, i32) {
    %c0_i32 = arith.constant 0 : i32
    %c0_i32_0 = arith.constant 0 : i32
    %c0_i32_1 = arith.constant 0 : i32
    return %c0_i32, %c0_i32_0 : i32, i32
  }
  func.func @transform_12(%arg0: i32) -> (i32, i32) {
    %c0_i32 = arith.constant 0 : i32
    %c0_i32_0 = arith.constant 0 : i32
    %c0_i32_1 = arith.constant 0 : i32
    return %c0_i32, %c0_i32_0 : i32, i32
  }
  func.func @transform_13(%arg0: i32) -> (i32, i32) {
    %c0_i32 = arith.constant 0 : i32
    %c0_i32_0 = arith.constant 0 : i32
    return %arg0, %c0_i32 : i32, i32
  }
}

</mosaic_0001>

<bundles_post_ra>
// kernel: tpu_custom_call.1
= control target key start
LH: loop header
LB: loop body
LE: loop exit
PB: predicated region body
PF: predicated region fallthrough
CT: control target
= control target key end

     0   :  { %s1303_s0 = inlined_call_operand.vmem [shape: bf16[16,16], index: 0, kind: input, shape index: {}]   ;;  %s1304_s1 = inlined_call_operand.vmem [shape: bf16[16,32], index: 1, kind: input, shape index: {}]   ;;  %s1305_s2 = inlined_call_operand.vmem [shape: f32[1,32], index: 2, kind: input, shape index: {}]   ;;  %s1306_s3 = inlined_call_operand.vmem [shape: bf16[32,16], index: 3, kind: input, shape index: {}]   ;;  %s1307_s4 = inlined_call_operand.vmem [shape: f32[1,16], index: 4, kind: input, shape index: {}]   ;;  %s1308_s5 = inlined_call_operand.vmem [shape: bf16[16,8], index: 5, kind: input, shape index: {}]   ;;  %s1309_s6 = inlined_call_operand.vmem [shape: f32[1,8], index: 6, kind: input, shape index: {}]   ;;  %s1310_s7 = inlined_call_operand.vmem [shape: bf16[8,8], index: 7, kind: input, shape index: {}]   ;;  %s1311_s8 = inlined_call_operand.vmem [shape: f32[1,8], index: 8, kind: input, shape index: {}]   ;;  %s1312_s9 = inlined_call_operand.vmem [shape: bf16[8,8], index: 9, kind: input, shape index: {}]   ;;  %s1313_s10 = inlined_call_operand.vmem [shape: f32[1,8], index: 10, kind: input, shape index: {}]   ;;  %s1314_s11 = inlined_call_operand.vmem [shape: bf16[8,128], index: 11, kind: input, shape index: {}]   ;;  %s1315_s12 = inlined_call_operand.vmem [shape: f32[1,128], index: 12, kind: input, shape index: {}]   ;;  %s1316_s13 = inlined_call_operand.hbm [shape: bf16[16,128], index: 13, kind: output, shape index: {}]  }
   0x1   :  { %1317 = sst [smem:[#allocation5_spill]] %s1303_s0 }
   0x2   :  { %1318 = sst [smem:[#allocation6_spill]] %s1304_s1 }
   0x3   :  { %1319 = sst [smem:[#allocation7_spill]] %s1305_s2 }
   0x4   :  { %18 = vsyncpa [#allocation3], 0 }
   0x5   :  { %20 = vsyncpa [#allocation3 + $0x1], 0  ;;  %s1138_s25 = smov 0   ;;  %s1140_s26 = smov 0  }
   0x6   :  { %s1142_s27 = smov 0   ;;  %s1144_s28 = smov 0  }
   0x7 LB: > { %s1159_s29 = sadd.s32 4294967295, %s1063_s28   ;;  %s871_s30 = sadd.s32 4294967294, %s1063_s28   ;;  %s1063_s28 = sphi %s1144_s28, %s1328_s28   ;;  %s1059_s27 = sphi %s1142_s27, %s1327_s27   ;;  %s1055_s26 = sphi %s1140_s26, %s1326_s26   ;;  %s1051_s25 = sphi %s1138_s25, %s1325_s25  }
   0x8   : > { %s1163_s14 = sadd.s32 1, %s1063_s28   ;;  %s311_s15 = sadd.s32 1, %s1059_s27 }
   0x9   : > { %s308_s16 = ssub.s32 %s1063_s28, %s1163_s14  ;;  %p321_p0 = scmp.ne.s32.totalorder %s1059_s27, %s1055_s26 }
   0xa   : > { %p309_p1 = scmp.eq.s32.totalorder %s308_s16, 0  ;;  %p322_p2 = scmp.eq.s32.totalorder %s1159_s29, 1 }
   0xb   : > { %p327_p3 = scmp.ne.s32.totalorder %s1055_s26, %s1051_s25  ;;  %p328_p4 = scmp.eq.s32.totalorder %s871_s30, 1 }
   0xc   : > { %s1174_s17 = scalar_select %p309_p1, %s1059_s27, %s311_s15  }
   0xd   : > { %p1176_p5 = por %p322_p2, %p321_p0  ;;  %p1180_p6 = por %p328_p4, %p327_p3 }
   0xe   : > { %p874_p7 = scmp.ge.s32.totalorder %s1063_s28, 1  ;;  %p389_p8 = scmp.lt.s32.totalorder %s1063_s28, 3 }
  0x10   : > { %p390_p9 = pnand %p874_p7, %p389_p8 }
  0x11   : > { %s1322_s1 = sld [smem:[#allocation6_spill]] (!%p390_p9)  ;;  %p432_p10 = scmp.lt.s32.totalorder (!%p390_p9), %s1159_s29, 1 }
  0x12   : > { %393 = sbr.rel (%p390_p9) target bundleno = 1294 (0x50e), region = 72  ;;  %s1323_s0 = sld [smem:[#allocation5_spill]] (!%p390_p9) }
  0x13   : > { %s1324_s2 = sld [smem:[#allocation7_spill]] (!%p390_p9)  ;;  %s429_s30 = sand.u32 (!%p390_p9), 1, %s1055_s26  }
  0x14   : > { %s894_s21 = sshll.u32 (!%p390_p9), %s1159_s29, 6  ;;  %s799_s16 = scalar_lea.sflag (!%p390_p9), [#allocation3], %s429_s30 }
  0x17   : > { %v989_v0 = vld [vmem:[%s1322_s1] sm:$0xff]   ;;  %v1065_v1 = vmov 0.0   ;;  %vm1066_vm0 = vmmov 0   ;;  %s433_s22 = scalar_select %p432_p10, %s1159_s29, 1  ;;  %vm453_vm1 = vcmask 130048   ;;  %v990_v3 = vld [vmem:[%s1306_s3 + $0x8] sm:$0xff]  }
  0x18   : > { %910 = vmatprep.subr.bf16.mxu0 %v1065_v1  ;;  %916 = vmatprep.subr.bf16.mxu1 %v1065_v1  ;;  %v991_v4 = vld [vmem:[%s1306_s3] sm:$0xff]   ;;  %vm522_vm2 = vcmask 261120   ;;  %vm640_vm3 = vcmask 1043456   ;;  %vm636_vm4 = vcmask 64512   ;;  %s1262_s1 = scalar_lea.hbm %s1316_s13, %s894_s21 }
  0x19   : > { %911 = vmatpush3.bf16.msra.mxu0 %v989_v0  ;;  %912 = vmatprep.mubr.msk.bf16.mxu0 %vm1066_vm0, %v1065_v1  ;;  %s876_s23 = sshll.u32 %s433_s22, 2  ;;  %v877_v5 = vld [vmem:[%s1324_s2] ss:$0 sm:$0xff] }
  0x1a   : > { %920 = vmatprep.mubr.msk.bf16.mxu1 %vm1066_vm0, %v1065_v1  ;;  %924 = vmatprep.subr.bf16.mxu0 %v1065_v1  ;;  %s435_s15 = scalar_lea.vmem %s1323_s0, %s876_s23  ;;  %v992_v13 = vld [vmem:[%s1308_s5] sm:$0xff]  }
  0x1b   : > { %v437_v2 = vld [vmem:[%s435_s15] sm:$0xf]  ;;  %917 = vmatpush3.bf16.msra.mxu1 %v990_v3  ;;  %s875_s15 = sshll.u32 %s429_s30, 2 }
  0x1c   : > { %913 = vmatmul.mubr.msk.bf16.vlgmr.msra.gmra.mxu0 %vm453_vm1, %v437_v2  ;;  %918 = vmatprep.subr.bf16.mxu1 %v1065_v1  ;;  %v880_v14 = vld [vmem:[%s1307_s4] ss:$0 sm:$0xff]  ;;  %s431_s22 = scalar_lea.vmem [#allocation2], %s875_s15  ;;  %s1067_s15 = smov [#allocation2]  }
  0x1d   : > { %926 = vmatprep.mubr.msk.bf16.mxu0 %vm1066_vm0, %v1065_v1  ;;  %925 = vmatpush3.bf16.msra.mxu0 %v992_v13  ;;  %v628_v22 = vld [vmem:[%s1310_s7] sm:$0xf]  ;;  %s812_s23 = sshll.u32 %s431_s22, 4  ;;  %s1007_s20 = sshll.u32 %s1067_s15, 4  ;;  %s1264_s23 = int_to_ptr.vmem [resolvable:$true] %s812_s23  ;;  %s1008_s20 = int_to_ptr.vmem [resolvable:$false] %s1007_s20 }
  0x1e   : > { %936 = vmatprep.subr.bf16.mxu0 %v1065_v1  ;;  %v642_v23 = vsel %vm640_vm3, %v628_v22, 0  ;;  %v884_v24 = vld [vmem:[%s1309_s6] ss:$0 sm:$0xff]  ;;  %s1003_s29 = scalar_lea.vmem %s1264_s23, 64  ;;  %s1009_s0 = scalar_lea.vmem %s1008_s20, 128 }
  0x1f   : > { %919 = vmatpush3.bf16.msra.mxu1 %v991_v4  ;;  %v686_v32 = vld [vmem:[%s1312_s9] sm:$0xf]  ;;  %p1004_p11 = scmp.ne.s32.totalorder %s1264_s23, %s1003_s29  ;;  %p1010_p0 = scmp.lt.s32.totalorder %s1264_s23, %s1008_s20 }
  0x20   : > { %930 = vmatprep.subr.bf16.mxu1 %v1065_v1  ;;  %v698_v33 = vsel %vm640_vm3, %v686_v32, 0  ;;  %v887_v34 = vld [vmem:[%s1311_s8] ss:$0 sm:$0xff]  ;;  %p1011_p1 = scmp.lt.s32.totalorder %s1009_s0, %s1003_s29 }
  0x21   : > { %v742_v42 = vld [vmem:[%s1314_s11] sm:$0xf]  ;;  %p1005_p12 = pnand %p1004_p11, %p1176_p5 }
  0x22   : > { %v754_v43 = vsel %vm640_vm3, %v742_v42, 0  ;;  %v889_v44 = vld [vmem:[%s1313_s10] ss:$0 sm:$0xff]  ;;  %p1012_p2 = por %p1011_p1, %p1010_p0 }
  0x23   : > { %v891_v52 = vld [vmem:[%s1315_s12] ss:$0 sm:$0xff]  ;;  %p1006_p13 = pneg %p1005_p12 }
  0x25   : > { %p1013_p3 = pnand %p1012_p2, %p1006_p13 }
  0xdc   : > { %v491_v6 = vpop.f32.mrf.mxu0 }
  0xdd   : > { %v492_v7 = vadd.f32 %v877_v5, %v491_v6 }
  0xde   : > { %v914_v8 = vpop.f32.mrf.mxu0 }
  0xdf   : > { %993 = vtanh.f32 %v492_v7 }
  0xe0   : > { %v494_v9 = vpop.f32.mrf.mxu0 }
  0xe2   : > { %v915_v10 = vpop.f32.mrf.mxu0 }
  0xec   : > { %v994_v11 = vpop.eup %993 }
  0xed   : > { %v498_v12 = vpack.c.bf16 %v994_v11, %v994_v11 }
  0xef   : > { %921 = vmatmul.mubr.msk.bf16.vlgmr.msra.gmra.mxu1 %vm522_vm2, %v498_v12 }
  0xf0   : > { %932 = vmatprep.mubr.msk.bf16.mxu1 %vm1066_vm0, %v1065_v1  ;;  %931 = vmatpush3.bf16.msra.mxu1 %v642_v23 }
  0xf1   : > { %942 = vmatprep.subr.bf16.mxu1 %v1065_v1 }
 0x1af   : > { %v560_v15 = vpop.f32.mrf.mxu1 }
 0x1b0   : > { %v561_v16 = vadd.f32 %v880_v14, %v560_v15 }
 0x1b1   : > { %v922_v17 = vpop.f32.mrf.mxu1 }
 0x1b2   : > { %995 = vtanh.f32 %v561_v16 }
 0x1b3   : > { %v563_v18 = vpop.f32.mrf.mxu1 }
 0x1b5   : > { %v923_v19 = vpop.f32.mrf.mxu1 }
 0x1bf   : > { %v996_v20 = vpop.eup %995 }
 0x1c0   : > { %v567_v21 = vpack.c.bf16 %v996_v20, %v996_v20 }
 0x1c2   : > { %927 = vmatmul.mubr.msk.bf16.vlgmr.msra.gmra.mxu0 %vm453_vm1, %v567_v21 }
 0x1c3   : > { %938 = vmatprep.mubr.msk.bf16.mxu0 %vm1066_vm0, %v1065_v1  ;;  %937 = vmatpush3.bf16.msra.mxu0 %v698_v33 }
 0x282   : > { %v620_v25 = vpop.f32.mrf.mxu0 }
 0x283   : > { %v621_v26 = vadd.f32 %v884_v24, %v620_v25 }
 0x284   : > { %v928_v27 = vpop.f32.mrf.mxu0 }
 0x285   : > { %997 = vtanh.f32 %v621_v26 }
 0x286   : > { %v623_v28 = vpop.f32.mrf.mxu0 }
 0x288   : > { %v929_v29 = vpop.f32.mrf.mxu0 }
 0x292   : > { %v998_v30 = vpop.eup %997 }
 0x293   : > { %v627_v31 = vpack.c.bf16 %v998_v30, %v998_v30 }
 0x295   : > { %933 = vmatmul.mubr.msk.bf16.vlgmr.msra.gmra.mxu1 %vm636_vm4, %v627_v31 }
 0x296   : > { %944 = vmatprep.mubr.msk.bf16.mxu1 %vm1066_vm0, %v1065_v1  ;;  %943 = vmatpush3.bf16.msra.mxu1 %v754_v43 }
 0x355   : > { %v678_v35 = vpop.f32.mrf.mxu1 }
 0x356   : > { %v679_v36 = vadd.f32 %v887_v34, %v678_v35 }
 0x357   : > { %v934_v37 = vpop.f32.mrf.mxu1 }
 0x358   : > { %999 = vtanh.f32 %v679_v36 }
 0x359   : > { %v681_v38 = vpop.f32.mrf.mxu1 }
 0x35b   : > { %v935_v39 = vpop.f32.mrf.mxu1 }
 0x365   : > { %v1000_v40 = vpop.eup %999 }
 0x366   : > { %v685_v41 = vpack.c.bf16 %v1000_v40, %v1000_v40 }
 0x368   : > { %939 = vmatmul.mubr.msk.bf16.vlgmr.msra.gmra.mxu0 %vm636_vm4, %v685_v41 }
 0x428   : > { %v734_v45 = vpop.f32.mrf.mxu0 }
 0x429   : > { %v735_v46 = vadd.f32 %v889_v44, %v734_v45 }
 0x42a   : > { %v940_v47 = vpop.f32.mrf.mxu0 }
 0x42b   : > { %1001 = vtanh.f32 %v735_v46 }
 0x42c   : > { %v737_v48 = vpop.f32.mrf.mxu0 }
 0x42e   : > { %v941_v49 = vpop.f32.mrf.mxu0 }
 0x438   : > { %v1002_v50 = vpop.eup %1001 }
 0x439   : > { %v741_v51 = vpack.c.bf16 %v1002_v50, %v1002_v50 }
 0x43b   : > { %945 = vmatmul.mubr.msk.bf16.vlgmr.msra.gmra.mxu1 %vm636_vm4, %v741_v51 }
 0x4fb   : > { %v790_v53 = vpop.f32.mrf.mxu1 }
 0x4fc   : > { %v791_v54 = vadd.f32 %v891_v52, %v790_v53 }
 0x4fd   : > { %v946_v55 = vpop.f32.mrf.mxu1 }
 0x4fe   : > { %v796_v56 = vpack.c.bf16 %v791_v54, %v791_v54 }
 0x4ff   : > { %v793_v57 = vpop.f32.mrf.mxu1 }
 0x500   : > { %797 = vst [vmem:[%s431_s22] sm:$0xf] %v796_v56 }
 0x501   : > { %v947_v58 = vpop.f32.mrf.mxu1 }
 0x502   : > { %1016 = shalt.err (!%p1013_p3)
}
 0x503   : > { %s1017_s21 = scalar_lea.hbm %s1262_s1, 64  ;;  %s1021_s24 = scalar_lea.hbm %s1316_s13, 128 }
 0x504   : > { %p1018_p4 = scmp.ne.s32.totalorder %s1262_s1, %s1017_s21  ;;  %p1022_p9 = scmp.lt.s32.totalorder %s1262_s1, %s1316_s13 }
 0x505   : > { %p1023_p10 = scmp.lt.s32.totalorder %s1021_s24, %s1017_s21 }
 0x506   : > { %p1019_p7 = pnand %p1018_p4, %p1176_p5 }
 0x507   : > { %p1024_p11 = por %p1023_p10, %p1022_p9 }
 0x508   : > { %p1020_p8 = pneg %p1019_p7 }
 0x50a   : > { %p1025_p12 = pnand %p1024_p11, %p1020_p8 }
 0x50c   : > { %1028 = shalt.err (!%p1025_p12)
}
 0x50d   : > { %948 = dma.vmem_to_hbm [thread:$0]  (%p1176_p5), %s1264_s23, 64, %s1262_s1, %s799_s16  }
 0x50e PF: > { %p954_p13 = scmp.ge.s32.totalorder %s1063_s28, 2  ;;  %s824_s29 = sand.u32 1, %s1051_s25  }
 0x50f   : > { %s825_s2 = scalar_lea.sflag [#allocation3], %s824_s29 }
 0x510   : > { %p951_p0 = pnand %p954_p13, %p1180_p6 }
 0x512   : > { %p952_p1 = pneg %p951_p0 }
 0x514   : > { %1046 = dma.done.wait (%p952_p1), %s825_s2, 64  }
 0x515   : > { %1048 = vsyncadd (%p952_p1), %s825_s2, 4294967232  ;;  %p23_p2 = scmp.ge.s32.totalorder %s1163_s14, 4   ;;  %s1325_s25 = smov %s1055_s26 }
 0x516   : > { %s1326_s26 = smov %s1059_s27  ;;  %s1327_s27 = smov %s1174_s17 }
 0x517   : > { %s1328_s28 = smov %s1163_s14  ;;  %25 = sbr.rel (!%p23_p2) target bundleno = 7 (0x7), region = 107 }
 0x51c   :  { %830 = vsyncpa [#allocation3], 1 }
 0x51d   :  { %832 = vsyncpa [#allocation3 + $0x1], 1 }

</bundles_post_ra>
